<compile_context>
chip_gen: v6e
topology: v6e:2x2x1
jax: 0.10.0
libtpu: 0.0.40
codegen_flags: <defaults>
</compile_context>

<pallas_src>
import functools

import jax
import jax.numpy as jnp
from jax import lax
from jax.experimental import pallas as pl
from jax.experimental.pallas import tpu as pltpu


def _scene_transition_kernel(lt_ref, w_ref, bias_ref, prev_ref, embed_ref, out_ref):
    """Batch-major inputs, feature-major (lane-dense) output.

    lt_ref   : (S, S)   log_softmax(trans_logits, axis=1).T   (resident)
    w_ref    : (S, E)   emitter weight, torch Linear layout   (resident)
    bias_ref : (S, 1)   emitter bias                          (resident)
    prev_ref : (TB, S)  prev_state_dist tile, batch on sublanes
    embed_ref: (TB, E)  latent_embed tile, batch on sublanes
    out_ref  : (S, TB)  posterior tile, batch on lanes (unmasked vst)
    """
    # Contract the last dim of both operands ("trans_b" form): the MXU loads the
    # batch-major operand transposed for free and emits (S, TB) directly.
    dims = (((1,), (1,)), ((), ()))

    log_prev = jnp.log(prev_ref[...].astype(jnp.float32) + 1e-8)           # (TB, S)
    logits = lax.dot_general(lt_ref[...], log_prev, dims,
                             preferred_element_type=jnp.float32)           # (S, TB)
    logits = logits + lax.dot_general(w_ref[...], embed_ref[...], dims,
                                      preferred_element_type=jnp.float32)  # (S, TB)
    logits = logits + bias_ref[...]                                        # bcast over lanes

    # Softmax over states (sublane axis).  The reference's emission log_softmax
    # is a per-batch-column constant shift and is absorbed here exactly.
    m = jnp.max(logits, axis=0, keepdims=True)                             # (1, TB)
    e = jnp.exp(logits - m)                                                # EUP
    s = jnp.sum(e, axis=0, keepdims=True)                                  # XLU sublane reduce
    r = pl.reciprocal(s, approx=True)                                      # EUP vrcp
    r = r * (2.0 - s * r)                                                  # 1 Newton step -> ~f32
    out_ref[...] = e * r


def _round_up(x, m):
    return ((x + m - 1) // m) * m


@functools.partial(jax.jit, static_argnames=("tile_b",))
def scene_transition_forward(prev_state_dist, latent_embed, trans_logits, w, b,
                             *, tile_b=8192):
    """prev_state_dist: (B,S), latent_embed: (B,E) [f32 or bf16],
    trans_logits: (S,S), w: (S,E) torch-Linear layout, b: (S,).
    Returns posterior (B,S) float32."""
    B, S = prev_state_dist.shape
    E = latent_embed.shape[1]

    # ---- parameter-sized prep (runs once per call, outside the grid) ----
    log_trans_t = jax.nn.log_softmax(trans_logits.astype(jnp.float32), axis=1).T  # (S, S)
    emb_dtype = latent_embed.dtype
    if emb_dtype not in (jnp.float32, jnp.bfloat16):
        latent_embed = latent_embed.astype(jnp.float32)
        emb_dtype = jnp.float32
    w_k = w.astype(emb_dtype)                                # match the embed stream dtype
    bias2 = b.astype(jnp.float32).reshape(S, 1)              # (S, 1)

    # ---- batch tiling: no transposes, no padding (Pallas masks ragged tail) ----
    if B <= 256:
        tb = B                         # one full-extent block
    else:
        # Multiple of 128 (lane-dense output blocks, 8-divisible input sublanes),
        # capped so the grid has >= 2 steps -> both v7x TensorCores get work.
        tb = max(128, min(int(tile_b), _round_up(pl.cdiv(B, 2), 128)))
    grid = (pl.cdiv(B, tb),)

    cost = pl.CostEstimate(
        flops=2 * B * S * (S + E),
        transcendentals=B * (2 * S + 1),
        bytes_accessed=B * (S * int(prev_state_dist.dtype.itemsize)
                            + E * int(jnp.dtype(emb_dtype).itemsize)
                            + S * 4),
    )

    out_t = pl.pallas_call(
        _scene_transition_kernel,
        out_shape=jax.ShapeDtypeStruct((S, B), jnp.float32),
        grid_spec=pltpu.PrefetchScalarGridSpec(
            num_scalar_prefetch=0,
            grid=grid,
            in_specs=[
                pl.BlockSpec((S, S), lambda i: (0, 0)),      # log_trans.T, resident
                pl.BlockSpec((S, E), lambda i: (0, 0)),      # emitter W, resident
                pl.BlockSpec((S, 1), lambda i: (0, 0)),      # emitter bias, resident
                pl.BlockSpec((tb, S), lambda i: (i, 0)),     # prev tile, batch-major
                pl.BlockSpec((tb, E), lambda i: (i, 0)),     # embed tile, batch-major
            ],
            out_specs=pl.BlockSpec((S, tb), lambda i: (0, i)),
        ),
        compiler_params=pltpu.CompilerParams(
            # Batch tiles are independent -> sharded across v7x's 2 TensorCores.
            dimension_semantics=("parallel",),
        ),
        cost_estimate=cost,
    )(log_trans_t, w_k, bias2, prev_state_dist, latent_embed)

    # (S, B) feature-major -> (B, S).  Cheap tail copy (S=8 columns); consumers
    # that accept feature-major output can use out_t directly.
    return out_t.T


def reference_forward(prev_state_dist, latent_embed, trans_logits, w, b):
    """Pure-JAX reference mirroring the PyTorch module exactly."""
    log_trans = jax.nn.log_softmax(trans_logits, axis=1)
    log_prior = jnp.log(prev_state_dist + 1e-8) @ log_trans
    emission_logits = latent_embed @ w.T + b
    log_emission = jax.nn.log_softmax(emission_logits, axis=-1)
    return jax.nn.softmax(log_prior + log_emission, axis=1)


if __name__ == "__main__":
    B, S, E = 2, 8, 32
    key = jax.random.PRNGKey(0)
    k1, k2, k3, k4, k5 = jax.random.split(key, 5)

    # Deterministic parameters (module __init__ gives shapes; small noise so the
    # transition matrix is non-trivial yet deterministic).
    trans_logits = 0.1 * jax.random.normal(k1, (S, S), dtype=jnp.float32)
    w = jax.random.normal(k2, (S, E), dtype=jnp.float32) * (1.0 / (E ** 0.5))
    b = 0.01 * jax.random.normal(k3, (S,), dtype=jnp.float32)

    # Inputs: prev_state_dist is a valid probability distribution per row.
    raw = jax.random.uniform(k4, (B, S), dtype=jnp.float32) + 0.1
    prev_state_dist = raw / jnp.sum(raw, axis=1, keepdims=True)
    latent_embed = jax.random.normal(k5, (B, E), dtype=jnp.float32)

    out = jax.block_until_ready(
        scene_transition_forward(prev_state_dist, latent_embed, trans_logits, w, b))
    ref = reference_forward(prev_state_dist, latent_embed, trans_logits, w, b)
    assert out.shape == (B, S)
    assert jnp.allclose(out, ref, atol=1e-4, rtol=1e-4), (out, ref)
    assert jnp.allclose(jnp.sum(out, axis=1), 1.0, atol=1e-5)

    # Gridded / ragged-tail / megacore path: B=300 with tile_b=256 -> grid=(2,);
    # the second block is ragged (44 valid lanes, masked on store, no pad copy).
    B2 = 300
    raw2 = jax.random.uniform(jax.random.fold_in(key, 11), (B2, S), jnp.float32) + 0.1
    prev2 = raw2 / jnp.sum(raw2, axis=1, keepdims=True)
    embed2 = jax.random.normal(jax.random.fold_in(key, 13), (B2, E), jnp.float32)
    out2 = jax.block_until_ready(
        scene_transition_forward(prev2, embed2, trans_logits, w, b, tile_b=256))
    ref2 = reference_forward(prev2, embed2, trans_logits, w, b)
    assert out2.shape == (B2, S)
    assert jnp.allclose(out2, ref2, atol=1e-4, rtol=1e-4)
    assert jnp.allclose(jnp.sum(out2, axis=1), 1.0, atol=1e-5)

    # bf16 embed stream (halves the dominant HBM traffic); normalization stays
    # f32-exact, values compared loosely against the f32 reference.
    out3 = jax.block_until_ready(
        scene_transition_forward(prev2, embed2.astype(jnp.bfloat16),
                                 trans_logits, w, b, tile_b=256))
    assert out3.shape == (B2, S)
    assert jnp.allclose(jnp.sum(out3, axis=1), 1.0, atol=1e-5)
    assert jnp.allclose(out3, ref2, atol=3e-2, rtol=3e-2)

    print("KERNEL_OK")
</pallas_src>

<mosaic_0001>
module attributes {stable_mosaic.version = 11 : i64} {
  func.func @_scene_transition_kernel(%arg0: i32, %arg1: memref<8x8xf32, #tpu.memory_space<vmem>>, %arg2: memref<8x32xf32, #tpu.memory_space<vmem>>, %arg3: memref<8x1xf32, #tpu.memory_space<vmem>>, %arg4: memref<2x8xf32, #tpu.memory_space<vmem>>, %arg5: memref<2x32xf32, #tpu.memory_space<vmem>>, %arg6: memref<8x2xf32, #tpu.memory_space<vmem>>) attributes {dimension_semantics = [#tpu.dimension_semantics<parallel>], iteration_bounds = array<i64: 1>, scalar_prefetch = 0 : i64, scratch_operands = 0 : i64, tpu.core_type = #tpu.core_type<tc>, window_params = [{pipeline_mode = #tpu.pipeline_mode<synchronous>, transform_indices = @transform_0, window_bounds = array<i64: 8, 8>}, {pipeline_mode = #tpu.pipeline_mode<synchronous>, transform_indices = @transform_1, window_bounds = array<i64: 8, 32>}, {pipeline_mode = #tpu.pipeline_mode<synchronous>, transform_indices = @transform_2, window_bounds = array<i64: 8, 1>}, {transform_indices = @transform_3, window_bounds = array<i64: 2, 8>}, {transform_indices = @transform_4, window_bounds = array<i64: 2, 32>}, {transform_indices = @transform_5, window_bounds = array<i64: 8, 2>}]} {
    %c0 = arith.constant 0 : index
    %c0_0 = arith.constant 0 : index
    %0 = vector.load %arg4[%c0, %c0_0] : memref<2x8xf32, #tpu.memory_space<vmem>>, vector<2x8xf32>
    %cst = arith.constant 9.99999993E-9 : f32
    %1 = vector.broadcast %cst : f32 to vector<2x8xf32>
    %2 = arith.addf %0, %1 : vector<2x8xf32>
    %3 = math.log %2 : vector<2x8xf32>
    %c0_1 = arith.constant 0 : index
    %c0_2 = arith.constant 0 : index
    %4 = vector.load %arg1[%c0_1, %c0_2] : memref<8x8xf32, #tpu.memory_space<vmem>>, vector<8x8xf32>
    %cst_3 = arith.constant dense<0.000000e+00> : vector<8x2xf32>
    %5 = tpu.matmul %4, %3, %cst_3 {dimension_numbers = #tpu.dot_dimension_numbers<[1], [1], [0], [0], [0, 0, 1, 0], [], []>} : vector<8x8xf32>, vector<2x8xf32>, vector<8x2xf32> -> vector<8x2xf32>
    %c0_4 = arith.constant 0 : index
    %c0_5 = arith.constant 0 : index
    %6 = vector.load %arg2[%c0_4, %c0_5] : memref<8x32xf32, #tpu.memory_space<vmem>>, vector<8x32xf32>
    %c0_6 = arith.constant 0 : index
    %c0_7 = arith.constant 0 : index
    %7 = vector.load %arg5[%c0_6, %c0_7] : memref<2x32xf32, #tpu.memory_space<vmem>>, vector<2x32xf32>
    %cst_8 = arith.constant dense<0.000000e+00> : vector<8x2xf32>
    %8 = tpu.matmul %6, %7, %cst_8 {dimension_numbers = #tpu.dot_dimension_numbers<[1], [1], [0], [0], [0, 0, 1, 0], [], []>} : vector<8x32xf32>, vector<2x32xf32>, vector<8x2xf32> -> vector<8x2xf32>
    %9 = arith.addf %5, %8 : vector<8x2xf32>
    %c0_9 = arith.constant 0 : index
    %c0_10 = arith.constant 0 : index
    %10 = vector.load %arg3[%c0_9, %c0_10] : memref<8x1xf32, #tpu.memory_space<vmem>>, vector<8x1xf32>
    %11 = vector.broadcast %10 : vector<8x1xf32> to vector<8x2xf32>
    %12 = arith.addf %9, %11 : vector<8x2xf32>
    %cst_11 = arith.constant dense<0xFF800000> : vector<2xf32>
    %13 = vector.multi_reduction <maximumf>, %12, %cst_11 [0] : vector<8x2xf32> to vector<2xf32>
    %14 = vector.shape_cast %13 : vector<2xf32> to vector<1x2xf32>
    %15 = vector.broadcast %14 : vector<1x2xf32> to vector<8x2xf32>
    %16 = arith.subf %12, %15 : vector<8x2xf32>
    %17 = math.exp %16 : vector<8x2xf32>
    %cst_12 = arith.constant dense<0.000000e+00> : vector<2xf32>
    %18 = vector.multi_reduction <add>, %17, %cst_12 [0] : vector<8x2xf32> to vector<2xf32>
    %19 = vector.shape_cast %18 : vector<2xf32> to vector<1x2xf32>
    %20 = tpu.reciprocal %19 {approx = true} : vector<1x2xf32> -> vector<1x2xf32>
    %21 = arith.mulf %19, %20 : vector<1x2xf32>
    %cst_13 = arith.constant 2.000000e+00 : f32
    %22 = vector.broadcast %cst_13 : f32 to vector<1x2xf32>
    %23 = arith.subf %22, %21 : vector<1x2xf32>
    %24 = arith.mulf %20, %23 : vector<1x2xf32>
    %25 = vector.broadcast %24 : vector<1x2xf32> to vector<8x2xf32>
    %26 = arith.mulf %17, %25 : vector<8x2xf32>
    %c0_14 = arith.constant 0 : index
    %c0_15 = arith.constant 0 : index
    %27 = vector.load %arg6[%c0_14, %c0_15] : memref<8x2xf32, #tpu.memory_space<vmem>>, vector<8x2xf32>
    tpu.vector_store %arg6[%c0_14, %c0_15], %26 {strides = array<i32>} : memref<8x2xf32, #tpu.memory_space<vmem>>, vector<8x2xf32>,
    return
  }
  func.func @transform_0(%arg0: i32) -> (i32, i32) {
    %c0_i32 = arith.constant 0 : i32
    %c0_i32_0 = arith.constant 0 : i32
    %c0_i32_1 = arith.constant 0 : i32
    return %c0_i32, %c0_i32_0 : i32, i32
  }
  func.func @transform_1(%arg0: i32) -> (i32, i32) {
    %c0_i32 = arith.constant 0 : i32
    %c0_i32_0 = arith.constant 0 : i32
    %c0_i32_1 = arith.constant 0 : i32
    return %c0_i32, %c0_i32_0 : i32, i32
  }
  func.func @transform_2(%arg0: i32) -> (i32, i32) {
    %c0_i32 = arith.constant 0 : i32
    %c0_i32_0 = arith.constant 0 : i32
    %c0_i32_1 = arith.constant 0 : i32
    return %c0_i32, %c0_i32_0 : i32, i32
  }
  func.func @transform_3(%arg0: i32) -> (i32, i32) {
    %c0_i32 = arith.constant 0 : i32
    %c0_i32_0 = arith.constant 0 : i32
    return %arg0, %c0_i32 : i32, i32
  }
  func.func @transform_4(%arg0: i32) -> (i32, i32) {
    %c0_i32 = arith.constant 0 : i32
    %c0_i32_0 = arith.constant 0 : i32
    return %arg0, %c0_i32 : i32, i32
  }
  func.func @transform_5(%arg0: i32) -> (i32, i32) {
    %c0_i32 = arith.constant 0 : i32
    %c0_i32_0 = arith.constant 0 : i32
    return %c0_i32, %arg0 : i32, i32
  }
}

</mosaic_0001>

<bundles_post_ra>
// kernel: scene_transition_forward.1
= control target key start
LH: loop header
LB: loop body
LE: loop exit
PB: predicated region body
PF: predicated region fallthrough
CT: control target
= control target key end

     0   :  { %vm27_vm0 = vcmask 261120   ;;  %v244_v0 = vmov 0.0   ;;  %vm245_vm1 = vmmov 0   ;;  %v246_v6 = vmov 0   ;;  %s300_s4 = inlined_call_operand.vmem [shape: f32[2,32], index: 4, kind: input, shape index: {}]   ;;  %s301_s3 = inlined_call_operand.vmem [shape: f32[2,8], index: 3, kind: input, shape index: {}]   ;;  %s302_s1 = inlined_call_operand.vmem [shape: f32[8,32], index: 1, kind: input, shape index: {}]   ;;  %s303_s2 = inlined_call_operand.vmem [shape: f32[8,1], index: 2, kind: input, shape index: {}]   ;;  %s304_s0 = inlined_call_operand.vmem [shape: f32[8,8], index: 0, kind: input, shape index: {}]   ;;  %s305_s5 = inlined_call_operand.vmem [shape: f32[8,2], index: 5, kind: output, shape index: {}]  }
   0x1   :  { %224 = vmatprep.subr.mxu0 %v244_v0  ;;  %v26_v1 = vld [vmem:[%s300_s4] sm:$0x3]  ;;  %229 = vmatprep.subr.mxu1 %v244_v0  ;;  %vm104_vm2 = vcmask 64512   ;;  %vm188_vm3 = vcmask 15360  }
   0x2   :  { %v20_v2 = vld [vmem:[%s301_s3] sm:$0x3]  ;;  %225 = vmatpush3.xpose.msk.msra.mxu0 %vm27_vm0, %v26_v1  ;;  %226 = vmatprep.mubr.msk.f32.mxu0 %vm245_vm1, %v244_v0 }
   0x3   :  { %v21_v3 = vadd.f32 1e-08, %v20_v2  ;;  %v25_v4 = vld [vmem:[%s302_s1] sm:$0xff]  ;;  %231 = vmatprep.mubr.msk.f32.mxu1 %vm245_vm1, %v244_v0  ;;  %237 = vset.pattern.permute.xlu0 %v246_v6 }
   0x4   :  { %v181_v5 = vld [vmem:[%s303_s2] sm:$0xff] }
   0x5   :  { %238 = vlog2.f32 %v21_v3  ;;  %184 = vperm.xlu0 %237, %v181_v5   ;;  %227 = vmatmul.mubr.msk.f32.vlgmr.msra.gmra.mxu0 %vm27_vm0, %v25_v4  ;;  %v24_v9 = vld [vmem:[%s304_s0] sm:$0xff] }
  0x12   :  { %v239_v7 = vpop.eup %238 }
  0x13   :  { %v23_v8 = vmul.f32 0.6931472, %v239_v7 }
  0x15   :  { %230 = vmatpush3.xpose.msk.msra.mxu1 %vm104_vm2, %v23_v8 }
  0x18   :  { %232 = vmatmul.mubr.msk.f32.vlgmr.msra.gmra.mxu1 %vm104_vm2, %v24_v9 }
  0x80   :  { %v185_v13 = vpop.permute.xlu0 %184 }
  0xc5   :  { %v100_v10 = vpop.f32.mrf.mxu0 }
  0xc7   :  { %v228_v11 = vpop.f32.mrf.mxu0 }
  0xd8   :  { %v177_v12 = vpop.f32.mrf.mxu1 }
  0xd9   :  { %v178_v14 = vadd.f32 %v177_v12, %v100_v10 }
  0xda   :  { %v233_v15 = vpop.f32.mrf.mxu1 }
  0xdb   :  { %v187_v16 = vadd.f32 %v185_v13, %v178_v14 }
  0xdd   :  { %v189_v17 = vsel %vm188_vm3, %v187_v16, -inf }
  0xde   :  { %v190_v18 = vrot.slane %v189_v17, 4 }
  0xe0   :  { %v191_v19 = vmax.f32 %v189_v17, %v190_v18 }
  0xe2   :  { %v192_v20 = vrot.slane %v191_v19, 2 }
  0xe4   :  { %v193_v21 = vmax.f32 %v191_v19, %v192_v20 }
  0xe6   :  { %v194_v22 = vrot.slane %v193_v21, 1 }
  0xe8   :  { %v195_v23 = vmax.f32 %v193_v21, %v194_v22 }
  0xea   :  { %v196_v24 = vsub.f32 %v187_v16, %v195_v23 }
  0xec   :  { %v197_v25 = vmul.f32 1.442695, %v196_v24 }
  0xee   :  { %240 = vpow2.f32 %v197_v25 }
  0xfb   :  { %v241_v26 = vpop.eup %240 }
  0xfc   :  { %v199_v27 = vsel %vm188_vm3, %v241_v26, 0.0 }
  0xfd   :  { %v200_v28 = vrot.slane %v199_v27, 4 }
  0xff   :  { %v201_v29 = vadd.f32 %v200_v28, %v199_v27 }
 0x101   :  { %v202_v30 = vrot.slane %v201_v29, 2 }
 0x103   :  { %v203_v31 = vadd.f32 %v202_v30, %v201_v29 }
 0x105   :  { %v204_v32 = vrot.slane %v203_v31, 1 }
 0x107   :  { %v205_v33 = vadd.f32 %v204_v32, %v203_v31 }
 0x109   :  { %242 = vrcp.f32 %v205_v33 }
 0x116   :  { %v243_v34 = vpop.eup %242 }
 0x117   :  { %v207_v35 = vmul.f32 %v243_v34, %v205_v33 }
 0x119   :  { %v208_v36 = vsub.f32 2.0, %v207_v35 }
 0x11b   :  { %v209_v37 = vmul.f32 %v243_v34, %v208_v36 }
 0x11d   :  { %v210_v38 = vmul.f32 %v241_v26, %v209_v37 }
 0x11f   :  { %211 = vst.msk [vmem:[%s305_s5] sm:$0xff] %vm188_vm3, %v210_v38 }

</bundles_post_ra>
